<compile_context>
chip_gen: v6e
topology: v6e:2x2x1
jax: 0.10.0
libtpu: 0.0.40
codegen_flags: <defaults>
</compile_context>

<pallas_src>
import functools

import jax
import jax.numpy as jnp
from jax.experimental import pallas as pl
from jax.experimental.pallas import tpu as pltpu

# Shapes implied by the PyTorch module (wine dataset):
#   n_features = 13, hidden = 128, out = len(y) = 178 (quirk of the original code)
N_FEATURES = 13
K_PAD = 16          # fc1 contraction dim padded to a clean sublane multiple
HIDDEN = 128
N_OUT = 178
N_OUT_PAD = 256     # lane-dense output width (2 x 128)


def mlp_kernel(x_ref, w1_ref, b1_ref, w2_ref, b2_ref, o_ref):
    # fc1: bf16 MXU matmul, f32 accumulation, then bias + ReLU on the VPU.
    x = x_ref[...].astype(jnp.bfloat16)                               # (Bt, 16)
    h = jnp.dot(x, w1_ref[...], preferred_element_type=jnp.float32)   # (Bt, 128) f32
    h = jnp.maximum(h + b1_ref[...], 0.0)
    # fc2: bf16 MXU matmul into the padded, lane-dense 256-wide output.
    y = jnp.dot(h.astype(jnp.bfloat16), w2_ref[...],
                preferred_element_type=jnp.float32)                   # (Bt, 256) f32
    o_ref[...] = (y + b2_ref[...]).astype(o_ref.dtype)


def _forward_single_block(x_pad, w1p, b1p, w2p, b2p):
    """Tiny-batch path: no grid, whole (padded) arrays live in VMEM."""
    B = x_pad.shape[0]
    return pl.pallas_call(
        mlp_kernel,
        out_shape=jax.ShapeDtypeStruct((B, N_OUT_PAD), jnp.float32),
    )(x_pad, w1p, b1p, w2p, b2p)


def _forward_batch_grid(x_pad, w1p, b1p, w2p, b2p, tile_b):
    """Large-batch path: grid over (padded) batch; 'parallel' lets the two
    TensorCores on v7x split the grid. Weights/biases stay VMEM-resident
    across grid steps (their index_maps always return block (0, 0))."""
    B = x_pad.shape[0]
    return pl.pallas_call(
        mlp_kernel,
        out_shape=jax.ShapeDtypeStruct((B, N_OUT_PAD), jnp.float32),
        grid=(B // tile_b,),
        in_specs=[
            pl.BlockSpec((tile_b, K_PAD), lambda i: (i, 0)),
            pl.BlockSpec((K_PAD, HIDDEN), lambda i: (0, 0)),
            pl.BlockSpec((1, HIDDEN), lambda i: (0, 0)),
            pl.BlockSpec((HIDDEN, N_OUT_PAD), lambda i: (0, 0)),
            pl.BlockSpec((1, N_OUT_PAD), lambda i: (0, 0)),
        ],
        out_specs=pl.BlockSpec((tile_b, N_OUT_PAD), lambda i: (i, 0)),
        compiler_params=pltpu.CompilerParams(
            dimension_semantics=("parallel",)),
    )(x_pad, w1p, b1p, w2p, b2p)


@functools.partial(jax.jit, static_argnames=("tile_b",))
def net_forward(x, w1p, b1p, w2p, b2p, tile_b=256):
    """x: (B, N_FEATURES) f32 -> (B, N_OUT) f32, matching Net.forward."""
    B = x.shape[0]
    x_pad = jnp.pad(x, ((0, 0), (0, K_PAD - N_FEATURES)))
    if B >= tile_b:
        # Pad batch to a multiple of tile_b so any large batch takes the
        # gridded path (keeps per-step VMEM bounded); slice the rows back off.
        B_pad = ((B + tile_b - 1) // tile_b) * tile_b
        if B_pad != B:
            x_pad = jnp.pad(x_pad, ((0, B_pad - B), (0, 0)))
        out = _forward_batch_grid(x_pad, w1p, b1p, w2p, b2p, tile_b)
        return out[:B, :N_OUT]
    out = _forward_single_block(x_pad, w1p, b1p, w2p, b2p)
    return out[:, :N_OUT]


def init_params(key):
    """Deterministic init mimicking nn.Linear's U(-1/sqrt(fan_in), 1/sqrt(fan_in)).
    Stored as (in, out), i.e. W_torch.T."""
    k1, k2, k3, k4 = jax.random.split(key, 4)
    bound1 = 1.0 / jnp.sqrt(float(N_FEATURES))
    bound2 = 1.0 / jnp.sqrt(float(HIDDEN))
    w1 = jax.random.uniform(k1, (N_FEATURES, HIDDEN), jnp.float32, -bound1, bound1)
    b1 = jax.random.uniform(k2, (1, HIDDEN), jnp.float32, -bound1, bound1)
    w2 = jax.random.uniform(k3, (HIDDEN, N_OUT), jnp.float32, -bound2, bound2)
    b2 = jax.random.uniform(k4, (1, N_OUT), jnp.float32, -bound2, bound2)
    return w1, b1, w2, b2


def prepare_params(w1, b1, w2, b2):
    """One-time setup: zero-pad K 13->16 and N 178->256, cast weights to bf16."""
    w1p = jnp.zeros((K_PAD, HIDDEN), jnp.bfloat16)
    w1p = w1p.at[:N_FEATURES, :].set(w1.astype(jnp.bfloat16))
    b1p = b1.reshape(1, HIDDEN).astype(jnp.float32)
    w2p = jnp.zeros((HIDDEN, N_OUT_PAD), jnp.bfloat16)
    w2p = w2p.at[:, :N_OUT].set(w2.astype(jnp.bfloat16))
    b2p = jnp.zeros((1, N_OUT_PAD), jnp.float32)
    b2p = b2p.at[:, :N_OUT].set(b2.reshape(1, N_OUT))
    return w1p, b1p, w2p, b2p


def ref_forward(x, w1, b1, w2, b2):
    """Plain-JAX reference mimicking the kernel's bf16-input / f32-accum matmuls."""
    f32 = jnp.float32
    xb = x.astype(jnp.bfloat16).astype(f32)
    w1b = w1.astype(jnp.bfloat16).astype(f32)
    w2b = w2.astype(jnp.bfloat16).astype(f32)
    h = jnp.maximum(
        jnp.dot(xb, w1b, precision=jax.lax.Precision.HIGHEST) + b1.reshape(1, -1), 0.0)
    hb = h.astype(jnp.bfloat16).astype(f32)
    return jnp.dot(hb, w2b, precision=jax.lax.Precision.HIGHEST) + b2.reshape(1, -1)


if __name__ == "__main__":
    key = jax.random.PRNGKey(0)
    kx, kx2, kp = jax.random.split(key, 3)

    w1, b1, w2, b2 = init_params(kp)
    params = prepare_params(w1, b1, w2, b2)

    # Small batch -> single-block (no-grid) path.
    B = 8
    x = jax.random.normal(kx, (B, N_FEATURES), jnp.float32)
    out = jax.block_until_ready(net_forward(x, *params))
    ref = ref_forward(x, w1, b1, w2, b2)
    assert out.shape == (B, N_OUT)
    assert jnp.allclose(out, ref, atol=3e-3, rtol=3e-3)

    # Larger, non-multiple batch -> batch-gridded 'parallel' path (batch is
    # padded to a tile multiple inside the wrapper, sliced back afterwards).
    B2 = 500
    x2 = jax.random.normal(kx2, (B2, N_FEATURES), jnp.float32)
    out2 = jax.block_until_ready(net_forward(x2, *params))
    ref2 = ref_forward(x2, w1, b1, w2, b2)
    assert out2.shape == (B2, N_OUT)
    assert jnp.allclose(out2, ref2, atol=3e-3, rtol=3e-3)

    print("KERNEL_OK")
</pallas_src>

<mosaic_0001>
module attributes {stable_mosaic.version = 11 : i64} {
  func.func @mlp_kernel(%arg0: memref<8x16xf32, #tpu.memory_space<vmem>>, %arg1: memref<16x128xbf16, #tpu.memory_space<vmem>>, %arg2: memref<1x128xf32, #tpu.memory_space<vmem>>, %arg3: memref<128x256xbf16, #tpu.memory_space<vmem>>, %arg4: memref<1x256xf32, #tpu.memory_space<vmem>>, %arg5: memref<8x256xf32, #tpu.memory_space<vmem>>) attributes {dimension_semantics = [], scalar_prefetch = 0 : i64, scratch_operands = 0 : i64, tpu.core_type = #tpu.core_type<tc>} {
    %c0 = arith.constant 0 : index
    %c0_0 = arith.constant 0 : index
    %0 = vector.load %arg0[%c0, %c0_0] : memref<8x16xf32, #tpu.memory_space<vmem>>, vector<8x16xf32>
    %1 = arith.truncf %0 : vector<8x16xf32> to vector<8x16xbf16>
    %c0_1 = arith.constant 0 : index
    %c0_2 = arith.constant 0 : index
    %2 = vector.load %arg1[%c0_1, %c0_2] : memref<16x128xbf16, #tpu.memory_space<vmem>>, vector<16x128xbf16>
    %cst = arith.constant dense<0.000000e+00> : vector<8x128xf32>
    %3 = tpu.matmul %1, %2, %cst {dimension_numbers = #tpu.dot_dimension_numbers<[1], [0], [0], [1], [0, 0, 1, 1], [], []>} : vector<8x16xbf16>, vector<16x128xbf16>, vector<8x128xf32> -> vector<8x128xf32>
    %c0_3 = arith.constant 0 : index
    %c0_4 = arith.constant 0 : index
    %4 = vector.load %arg2[%c0_3, %c0_4] : memref<1x128xf32, #tpu.memory_space<vmem>>, vector<1x128xf32>
    %5 = vector.broadcast %4 : vector<1x128xf32> to vector<8x128xf32>
    %6 = arith.addf %3, %5 : vector<8x128xf32>
    %cst_5 = arith.constant 0.000000e+00 : f32
    %7 = vector.broadcast %cst_5 : f32 to vector<8x128xf32>
    %8 = arith.maximumf %6, %7 : vector<8x128xf32>
    %9 = arith.truncf %8 : vector<8x128xf32> to vector<8x128xbf16>
    %c0_6 = arith.constant 0 : index
    %c0_7 = arith.constant 0 : index
    %10 = vector.load %arg3[%c0_6, %c0_7] : memref<128x256xbf16, #tpu.memory_space<vmem>>, vector<128x256xbf16>
    %cst_8 = arith.constant dense<0.000000e+00> : vector<8x256xf32>
    %11 = tpu.matmul %9, %10, %cst_8 {dimension_numbers = #tpu.dot_dimension_numbers<[1], [0], [0], [1], [0, 0, 1, 1], [], []>} : vector<8x128xbf16>, vector<128x256xbf16>, vector<8x256xf32> -> vector<8x256xf32>
    %c0_9 = arith.constant 0 : index
    %c0_10 = arith.constant 0 : index
    %12 = vector.load %arg4[%c0_9, %c0_10] : memref<1x256xf32, #tpu.memory_space<vmem>>, vector<1x256xf32>
    %13 = vector.broadcast %12 : vector<1x256xf32> to vector<8x256xf32>
    %14 = arith.addf %11, %13 : vector<8x256xf32>
    %c0_11 = arith.constant 0 : index
    %c0_12 = arith.constant 0 : index
    %15 = vector.load %arg5[%c0_11, %c0_12] : memref<8x256xf32, #tpu.memory_space<vmem>>, vector<8x256xf32>
    tpu.vector_store %arg5[%c0_11, %c0_12], %14 {strides = array<i32>} : memref<8x256xf32, #tpu.memory_space<vmem>>, vector<8x256xf32>,
    return
  }
}

</mosaic_0001>

<bundles_post_ra>
// kernel: net_forward.1
= control target key start
LH: loop header
LB: loop body
LE: loop exit
PB: predicated region body
PF: predicated region fallthrough
CT: control target
= control target key end

     0   :  { %10 = vsyncpa [#allocation3], 0  ;;  %s423_s0 = inlined_call_operand.vmem [shape: f32[8,16], index: 0, kind: input, shape index: {}]   ;;  %s424_s1 = inlined_call_operand.vmem [shape: bf16[16,128], index: 1, kind: input, shape index: {}]   ;;  %s425_s2 = inlined_call_operand.vmem [shape: f32[1,128], index: 2, kind: input, shape index: {}]   ;;  %s426_s3 = inlined_call_operand.hbm [shape: bf16[128,256], index: 3, kind: input, shape index: {}]   ;;  %s427_s4 = inlined_call_operand.vmem [shape: f32[1,256], index: 4, kind: input, shape index: {}]   ;;  %s428_s5 = inlined_call_operand.hbm [shape: f32[8,256], index: 5, kind: output, shape index: {}]  }
   0x1   :  { %11 = vsyncpa [#allocation4], 0  ;;  %s368_s18 = smov [#allocation2]  }
   0x2   :  { %s23_s19 = sshll.u32 %s368_s18, 4  ;;  %s24_s19 = int_to_ptr.vmem [resolvable:$true] %s23_s19 }
   0x3   :  { %s332_s20 = scalar_lea.vmem %s24_s19, 2048  ;;  %p337_p1 = scmp.lt.s32.totalorder %s24_s19, %s24_s19 }
   0x4   :  { %p333_p0 = scmp.ne.s32.totalorder %s24_s19, %s332_s20  ;;  %p338_p2 = scmp.lt.s32.totalorder %s332_s20, %s332_s20 }
   0x6   :  { %p339_p3 = por %p338_p2, %p337_p1 }
   0x8   :  { %p340_p4 = pnand %p339_p3, %p333_p0 }
   0xa   :  { %343 = shalt.err (!%p340_p4)
}
   0xb   :  { %s369_s21 = smov 128   ;;  %s370_s22 = smov 8  }
   0xc   :  { %29 = dma.hbm_to_vmem [thread:$0]  %s426_s3, 2048, %s24_s19, [#allocation3], %s369_s21, %s369_s21, %s370_s22  }
   0xd   :  { %364 = dma.done.wait [#allocation3], 2048  }
   0xe   :  { %365 = vsyncadd [#allocation3], 4294965248  ;;  %v371_v0 = vmov 0.0   ;;  %vm372_vm0 = vmmov 0   ;;  %v299_v1 = vld [vmem:[%s424_s1] sm:$0xff]   ;;  %vm53_vm1 = vcmask 130048   ;;  %v117_v29 = vlaneseq }
   0xf   :  { %286 = vmatprep.subr.bf16.mxu0 %v371_v0  ;;  %288 = vmatprep.mubr.msk.bf16.mxu0 %vm372_vm0, %v371_v0  ;;  %v36_v2 = vld [vmem:[%s423_s0] sm:$0xff]  ;;  %v300_v4 = vld [vmem:[#allocation2 + $0x74] ss:$8 sps:$4 sm:$0xff]   ;;  %v302_v5 = vld [vmem:[#allocation2 + $0x70] ss:$8 sps:$4 sm:$0xff]   ;;  %v373_v20 = vmov 0  }
  0x10   :  { %287 = vmatpush3.bf16.msra.mxu0 %v299_v1  ;;  %v37_v3 = vpack.c.bf16 %v36_v2, %v36_v2  ;;  %v303_v6 = vld [vmem:[#allocation2 + $0x64] ss:$8 sps:$4 sm:$0xff]   ;;  %207 = vmatprep.subr.bf16.mxu1 %v300_v4  ;;  %v305_v7 = vld [vmem:[#allocation2 + $0x60] ss:$8 sps:$4 sm:$0xff]   ;;  %v306_v8 = vld [vmem:[#allocation2 + $0x54] ss:$8 sps:$4 sm:$0xff]  }
  0x11   :  { %208 = vmatpush1.bf16.msra.mxu1 %v302_v5  ;;  %v308_v9 = vld [vmem:[#allocation2 + $0x50] ss:$8 sps:$4 sm:$0xff]   ;;  %v309_v10 = vld [vmem:[#allocation2 + $0x44] ss:$8 sps:$4 sm:$0xff]   ;;  %v311_v11 = vld [vmem:[#allocation2 + $0x40] ss:$8 sps:$4 sm:$0xff]   ;;  %239 = vmatprep.mubr.bf16.mxu1 %v373_v20 }
  0x12   :  { %209 = vmatprep.subr.bf16.mxu1 %v303_v6  ;;  %v312_v12 = vld [vmem:[#allocation2 + $0x34] ss:$8 sps:$4 sm:$0xff]   ;;  %v314_v13 = vld [vmem:[#allocation2 + $0x30] ss:$8 sps:$4 sm:$0xff]   ;;  %v315_v14 = vld [vmem:[#allocation2 + $0x24] ss:$8 sps:$4 sm:$0xff]  }
  0x13   :  { %289 = vmatmul.mubr.msk.bf16.vlgmr.msra.gmra.mxu0 %vm53_vm1, %v37_v3  ;;  %v317_v15 = vld [vmem:[#allocation2 + $0x20] ss:$8 sps:$4 sm:$0xff]   ;;  %v318_v16 = vld [vmem:[#allocation2 + $0x14] ss:$8 sps:$4 sm:$0xff]   ;;  %v320_v17 = vld [vmem:[#allocation2 + $0x10] ss:$8 sps:$4 sm:$0xff]  }
  0x14   :  { %v321_v18 = vld [vmem:[#allocation2 + $0x4] ss:$8 sps:$4 sm:$0xff]   ;;  %v323_v19 = vld [vmem:[#allocation2] ss:$8 sps:$4 sm:$0xff]   ;;  %v118_v30 = vshrl.u32 %v117_v29, 7 }
  0x15   :  { %210 = vmatpush1.bf16.msra.mxu1 %v305_v7  ;;  %v265_v21 = vld [vmem:[%s425_s2] ss:$0 sm:$0xff]  ;;  %s374_s2 = smov [#allocation5]  }
  0x16   :  { %211 = vmatprep.subr.bf16.mxu1 %v306_v8  ;;  %v119_v31 = vsub.s32 0, %v118_v30  ;;  %v115_v32 = vld [vmem:[%s427_s4] sm:$0x3]  ;;  %v123_v33 = vsub.s32 1, %v118_v30  ;;  %s256_s30 = sshll.u32 %s374_s2, 4  ;;  %s257_s30 = int_to_ptr.vmem [resolvable:$true] %s256_s30 }
  0x17   :  { %s344_s6 = scalar_lea.vmem %s257_s30, 256  ;;  %p349_p6 = scmp.lt.s32.totalorder %s257_s30, %s257_s30 }
  0x18   :  { %v120_v34 = vrot.slane %v115_v32, %v119_v31  ;;  %v124_v35 = vrot.slane %v115_v32, %v123_v33  ;;  %p345_p5 = scmp.ne.s32.totalorder %s257_s30, %s344_s6  ;;  %p350_p7 = scmp.lt.s32.totalorder %s344_s6, %s344_s6 }
  0x19   :  { %212 = vmatpush1.bf16.msra.mxu1 %v308_v9 }
  0x1a   :  { %213 = vmatprep.subr.bf16.mxu1 %v309_v10  ;;  %p351_p8 = por %p350_p7, %p349_p6 }
  0x1c   :  { %p352_p9 = pnand %p351_p8, %p345_p5 }
  0x1d   :  { %214 = vmatpush1.bf16.msra.mxu1 %v311_v11 }
  0x1e   :  { %215 = vmatprep.subr.bf16.mxu1 %v312_v12 }
  0x21   :  { %216 = vmatpush1.bf16.msra.mxu1 %v314_v13 }
  0x22   :  { %217 = vmatprep.subr.bf16.mxu1 %v315_v14 }
  0x25   :  { %218 = vmatpush1.bf16.msra.mxu1 %v317_v15 }
  0x26   :  { %219 = vmatprep.subr.bf16.mxu1 %v318_v16 }
  0x29   :  { %220 = vmatpush1.bf16.msra.mxu1 %v320_v17 }
  0x2a   :  { %221 = vmatprep.subr.bf16.mxu1 %v321_v18 }
  0x2d   :  { %222 = vmatpush1.bf16.msra.mxu1 %v323_v19 }
  0xd3   :  { %v91_v22 = vpop.f32.mrf.mxu0 }
  0xd4   :  { %v92_v23 = vadd.f32 %v265_v21, %v91_v22 }
  0xd5   :  { %v290_v24 = vpop.f32.mrf.mxu0 }
  0xd6   :  { %v97_v25 = vmax.f32 %v92_v23, 0.0 }
  0xd7   :  { %v94_v26 = vpop.f32.mrf.mxu0 }
  0xd8   :  { %v98_v27 = vpack.c.bf16 %v97_v25, %v97_v25 }
  0xd9   :  { %v291_v28 = vpop.f32.mrf.mxu0 }
  0xda   :  { %240 = vmatmul.mubr.bf16.vlgmr.msra.gmra.mxu1 %v98_v27 }
 0x19a   :  { %v241_v36 = vpop.f32.mrf.mxu1 }
 0x19b   :  { %v242_v37 = vadd.f32 %v241_v36, %v120_v34 }
 0x19c   :  { %v243_v38 = vpop.f32.mrf.mxu1 }
 0x19d   :  { %248 = vst [vmem:[#allocation5] sm:$0xff] %v242_v37  ;;  %v244_v39 = vadd.f32 %v243_v38, %v124_v35 }
 0x19e   :  { %v245_v40 = vpop.f32.mrf.mxu1 }
 0x19f   :  { %249 = vst [vmem:[#allocation5 + $0x8] sm:$0xff] %v244_v39 }
 0x1a0   :  { %v246_v41 = vpop.f32.mrf.mxu1 }
 0x1a1   :  { %355 = shalt.err (!%p352_p9)
}
 0x1a2   :  { %259 = dma.vmem_to_hbm [thread:$0]  %s257_s30, 256, %s428_s5, [#allocation4]  }
 0x1a3   :  { %366 = dma.done.wait [#allocation4], 256  }
 0x1a4   :  { %367 = vsyncadd [#allocation4], 4294967040 }
 0x1a5   :  { %263 = vsyncpa [#allocation3], 1 }
 0x1a6   :  { %264 = vsyncpa [#allocation4], 1 }

</bundles_post_ra>
